<compile_context>
chip_gen: v5e
topology: v5e:2x2
jax: 0.10.0
libtpu: 0.0.40
codegen_flags: <defaults>
</compile_context>

<pallas_src>
import functools

import jax
import jax.numpy as jnp
from jax import lax
from jax.experimental import pallas as pl
from jax.experimental.pallas import tpu as pltpu

_NEG_INF = -1e30
_LANE = 128
_SUBLANE = 8


def _round_up(x, m):
    return ((x + m - 1) // m) * m


def _bigram_loss_kernel(idx_ref, tgt_ref, emb_ref, logits_ref, loss_ref, *,
                        n_tokens, tile_n, v_pad):
    """One token tile: gather logits (one-hot MXU matmul) + fused cross-entropy."""
    tile = pl.program_id(0)

    idx = idx_ref[...]                      # (tile_n, 1) int32
    tgt = tgt_ref[...]                      # (tile_n, 1) int32
    emb = emb_ref[...]                      # (v_pad, v_pad) f32 (VMEM resident)

    lane = lax.broadcasted_iota(jnp.int32, (tile_n, v_pad), 1)

    # Embedding lookup as an MXU-shaped one-hot matmul (128-aligned tiles).
    onehot = (lane == idx).astype(jnp.float32)                  # (tile_n, v_pad)
    logits = jnp.dot(onehot, emb, preferred_element_type=jnp.float32)
    logits_ref[...] = logits

    # Cross entropy: logsumexp - target logit.  Padded lanes hold -1e30, so
    # they never win the max and contribute exp(.) == 0 to the sum.
    m = jnp.max(logits, axis=-1, keepdims=True)                 # (tile_n, 1)
    lse = m + jnp.log(jnp.sum(jnp.exp(logits - m), axis=-1, keepdims=True))
    tgt_logit = jnp.sum(jnp.where(lane == tgt, logits, 0.0),
                        axis=-1, keepdims=True)                 # no 2nd one-hot temp
    per_token = lse - tgt_logit                                 # (tile_n, 1)

    # Mask padded rows (token index >= n_tokens) out of the loss.
    row = tile * tile_n + lax.broadcasted_iota(jnp.int32, (tile_n, 1), 0)
    partial = jnp.sum(jnp.where(row < n_tokens, per_token, 0.0))

    # Per-tile partial sum, broadcast into a lane/sublane-dense block so the
    # grid axis stays fully "parallel" (no cross-tile accumulator).
    loss_ref[...] = jnp.broadcast_to(partial, (1, _SUBLANE, _LANE)).astype(jnp.float32)


def _bigram_logits_kernel(idx_ref, emb_ref, logits_ref, *, tile_n, v_pad):
    """Inference path: logits only, no cross-entropy work."""
    idx = idx_ref[...]
    emb = emb_ref[...]
    lane = lax.broadcasted_iota(jnp.int32, (tile_n, v_pad), 1)
    onehot = (lane == idx).astype(jnp.float32)
    logits_ref[...] = jnp.dot(onehot, emb, preferred_element_type=jnp.float32)


def _pick_tile_n(n_tokens, v_pad):
    # Bigger tiles amortize per-step overhead; keep the per-step logits block
    # (tile_n x v_pad f32, double-buffered) comfortably inside VMEM.
    if n_tokens >= 512 and v_pad <= 2048:
        return 512
    if n_tokens >= 256:
        return 256
    return _round_up(max(n_tokens, _SUBLANE), _SUBLANE)


def bigram_forward(idx, emb_table, targets=None):
    """Forward pass of BigramLanguageModel.

    idx: (B, T) int token ids, emb_table: (V, V) float32, targets: (B, T) or None.
    Returns (logits, loss):
      targets is None -> logits (B, T, V), loss None
      otherwise       -> logits (B*T, V),  loss scalar f32  (matches PyTorch)
    """
    B, T = idx.shape
    V = emb_table.shape[0]
    N = B * T

    v_pad = _round_up(V, _LANE)
    tile_n = _pick_tile_n(N, v_pad)
    n_pad = _round_up(N, tile_n)
    num_tiles = n_pad // tile_n

    # Pad the table: real rows/cols at [:V,:V]; padded *columns* get -1e30 so
    # the fused logsumexp ignores them.  Padded rows are never selected.
    emb_p = jnp.full((v_pad, v_pad), _NEG_INF, dtype=jnp.float32)
    emb_p = emb_p.at[:V, :V].set(emb_table.astype(jnp.float32))

    idx_flat = jnp.zeros((n_pad, 1), jnp.int32).at[:N, 0].set(
        idx.reshape(N).astype(jnp.int32))

    idx_spec = pl.BlockSpec((tile_n, 1), lambda i: (i, 0))
    emb_spec = pl.BlockSpec((v_pad, v_pad), lambda i: (0, 0))      # resident
    logits_spec = pl.BlockSpec((tile_n, v_pad), lambda i: (i, 0))
    loss_spec = pl.BlockSpec((1, _SUBLANE, _LANE), lambda i: (i, 0, 0))

    # Explicit VMEM budget (double-buffered blocks + margin), capped well
    # below v7x's 64 MiB physical VMEM.
    block_bytes = 4 * (2 * v_pad * v_pad          # emb (double buffered)
                       + 2 * tile_n * v_pad       # logits out
                       + 4 * tile_n * _LANE       # idx/tgt blocks (lane padded)
                       + 2 * _SUBLANE * _LANE)    # loss partials
    vmem_limit = int(min(max(4 * block_bytes, 4 * 1024 * 1024), 64 * 1024 * 1024))

    compiler_params = pltpu.CompilerParams(
        dimension_semantics=("parallel",),
        vmem_limit_bytes=vmem_limit,
    )

    grid = (num_tiles,)

    if targets is None:
        cost = pl.CostEstimate(
            flops=2 * n_pad * v_pad * v_pad,
            transcendentals=0,
            bytes_accessed=4 * (v_pad * v_pad + n_pad + n_pad * v_pad),
        )
        kernel = functools.partial(_bigram_logits_kernel, tile_n=tile_n, v_pad=v_pad)
        logits_pad = pl.pallas_call(
            kernel,
            grid=grid,
            in_specs=[idx_spec, emb_spec],
            out_specs=logits_spec,
            out_shape=jax.ShapeDtypeStruct((n_pad, v_pad), jnp.float32),
            compiler_params=compiler_params,
            cost_estimate=cost,
        )(idx_flat, emb_p)
        logits = logits_pad[:N, :V].reshape(B, T, V)
        return logits, None

    tgt_flat = jnp.zeros((n_pad, 1), jnp.int32).at[:N, 0].set(
        targets.reshape(N).astype(jnp.int32))

    cost = pl.CostEstimate(
        flops=2 * n_pad * v_pad * v_pad + 6 * n_pad * v_pad,
        transcendentals=n_pad * v_pad + n_pad,
        bytes_accessed=4 * (v_pad * v_pad + 2 * n_pad + n_pad * v_pad
                            + num_tiles * _SUBLANE * _LANE),
    )
    kernel = functools.partial(_bigram_loss_kernel,
                               n_tokens=N, tile_n=tile_n, v_pad=v_pad)
    logits_pad, loss_partials = pl.pallas_call(
        kernel,
        grid=grid,
        in_specs=[idx_spec, idx_spec, emb_spec],
        out_specs=(logits_spec, loss_spec),
        out_shape=(
            jax.ShapeDtypeStruct((n_pad, v_pad), jnp.float32),
            jax.ShapeDtypeStruct((num_tiles, _SUBLANE, _LANE), jnp.float32),
        ),
        compiler_params=compiler_params,
        cost_estimate=cost,
    )(idx_flat, tgt_flat, emb_p)

    # PyTorch returns logits flattened to (B*T, V) when targets are given.
    logits = logits_pad[:N, :V]
    loss = jnp.sum(loss_partials[:, 0, 0]) / jnp.float32(N)
    return logits, loss


if __name__ == "__main__":
    key = jax.random.PRNGKey(0)
    k_emb, k_idx, k_tgt = jax.random.split(key, 3)

    vocab_size = 65   # e.g. tiny-shakespeare char vocab
    B, T = 2, 8

    # nn.Embedding default init: N(0, 1)
    emb_table = jax.random.normal(k_emb, (vocab_size, vocab_size), dtype=jnp.float32)
    idx = jax.random.randint(k_idx, (B, T), 0, vocab_size, dtype=jnp.int32)
    targets = jax.random.randint(k_tgt, (B, T), 0, vocab_size, dtype=jnp.int32)

    # Training path (flattened logits + loss, PyTorch shapes)
    logits, loss = bigram_forward(idx, emb_table, targets)
    jax.block_until_ready((logits, loss))

    # Inference path (logits only, CE skipped)
    logits_only, no_loss = bigram_forward(idx, emb_table)
    jax.block_until_ready(logits_only)
    assert no_loss is None

    # Reference check in plain JAX
    ref_logits = emb_table[idx]                                   # (B, T, V)
    flat = ref_logits.reshape(B * T, vocab_size)
    lse = jax.nn.logsumexp(flat, axis=-1)
    tgt_logit = jnp.take_along_axis(flat, targets.reshape(-1, 1), axis=-1)[:, 0]
    ref_loss = jnp.mean(lse - tgt_logit)

    assert logits.shape == (B * T, vocab_size)
    assert logits_only.shape == (B, T, vocab_size)
    assert jnp.allclose(logits, flat, atol=1e-5), "logits mismatch"
    assert jnp.allclose(logits_only, ref_logits, atol=1e-5), "logits (inference) mismatch"
    assert jnp.allclose(loss, ref_loss, atol=1e-5), "loss mismatch"

    print("KERNEL_OK")
</pallas_src>

<mosaic_0001>
module attributes {stable_mosaic.version = 11 : i64} {
  func.func @_bigram_loss_kernel(%arg0: i32, %arg1: memref<16x1xi32, #tpu.memory_space<vmem>>, %arg2: memref<16x1xi32, #tpu.memory_space<vmem>>, %arg3: memref<128x128xf32, #tpu.memory_space<vmem>>, %arg4: memref<16x128xf32, #tpu.memory_space<vmem>>, %arg5: memref<1x8x128xf32, #tpu.memory_space<vmem>>) attributes {dimension_semantics = [#tpu.dimension_semantics<parallel>], iteration_bounds = array<i64: 1>, scalar_prefetch = 0 : i64, scratch_operands = 0 : i64, tpu.core_type = #tpu.core_type<tc>, window_params = [{transform_indices = @transform_0, window_bounds = array<i64: 16, 1>}, {transform_indices = @transform_1, window_bounds = array<i64: 16, 1>}, {pipeline_mode = #tpu.pipeline_mode<synchronous>, transform_indices = @transform_2, window_bounds = array<i64: 128, 128>}, {transform_indices = @transform_3, window_bounds = array<i64: 16, 128>}, {transform_indices = @transform_4, window_bounds = array<i64: 1, 8, 128>}]} {
    %c0 = arith.constant 0 : index
    %c0_0 = arith.constant 0 : index
    %0 = vector.load %arg1[%c0, %c0_0] : memref<16x1xi32, #tpu.memory_space<vmem>>, vector<16x1xi32>
    %c0_1 = arith.constant 0 : index
    %c0_2 = arith.constant 0 : index
    %1 = vector.load %arg2[%c0_1, %c0_2] : memref<16x1xi32, #tpu.memory_space<vmem>>, vector<16x1xi32>
    %c0_3 = arith.constant 0 : index
    %c0_4 = arith.constant 0 : index
    %2 = vector.load %arg3[%c0_3, %c0_4] : memref<128x128xf32, #tpu.memory_space<vmem>>, vector<128x128xf32>
    %3 = tpu.iota {dimensions = array<i32: 1>} : vector<16x128xi32>
    %4 = vector.broadcast %0 : vector<16x1xi32> to vector<16x128xi32>
    %5 = arith.cmpi eq, %3, %4 : vector<16x128xi32>
    %6 = arith.extui %5 : vector<16x128xi1> to vector<16x128xi32>
    %7 = arith.sitofp %6 : vector<16x128xi32> to vector<16x128xf32>
    %cst = arith.constant dense<0.000000e+00> : vector<16x128xf32>
    %8 = tpu.matmul %7, %2, %cst {dimension_numbers = #tpu.dot_dimension_numbers<[1], [0], [0], [1], [0, 0, 1, 1], [], []>} : vector<16x128xf32>, vector<128x128xf32>, vector<16x128xf32> -> vector<16x128xf32>
    %c0_5 = arith.constant 0 : index
    %c0_6 = arith.constant 0 : index
    %9 = vector.load %arg4[%c0_5, %c0_6] : memref<16x128xf32, #tpu.memory_space<vmem>>, vector<16x128xf32>
    tpu.vector_store %arg4[%c0_5, %c0_6], %8 {strides = array<i32>} : memref<16x128xf32, #tpu.memory_space<vmem>>, vector<16x128xf32>,
    %cst_7 = arith.constant dense<0xFF800000> : vector<16xf32>
    %10 = vector.multi_reduction <maximumf>, %8, %cst_7 [1] : vector<16x128xf32> to vector<16xf32>
    %11 = vector.shape_cast %10 : vector<16xf32> to vector<16x1xf32>
    %12 = vector.broadcast %11 : vector<16x1xf32> to vector<16x128xf32>
    %13 = arith.subf %8, %12 : vector<16x128xf32>
    %14 = math.exp %13 : vector<16x128xf32>
    %cst_8 = arith.constant dense<0.000000e+00> : vector<16xf32>
    %15 = vector.multi_reduction <add>, %14, %cst_8 [1] : vector<16x128xf32> to vector<16xf32>
    %16 = vector.shape_cast %15 : vector<16xf32> to vector<16x1xf32>
    %17 = math.log %16 : vector<16x1xf32>
    %18 = arith.addf %11, %17 : vector<16x1xf32>
    %19 = vector.broadcast %1 : vector<16x1xi32> to vector<16x128xi32>
    %20 = arith.cmpi eq, %3, %19 : vector<16x128xi32>
    %cst_9 = arith.constant 0.000000e+00 : f32
    %21 = vector.broadcast %cst_9 : f32 to vector<16x128xf32>
    %22 = arith.select %20, %8, %21 : vector<16x128xi1>, vector<16x128xf32>
    %cst_10 = arith.constant dense<0.000000e+00> : vector<16xf32>
    %23 = vector.multi_reduction <add>, %22, %cst_10 [1] : vector<16x128xf32> to vector<16xf32>
    %24 = vector.shape_cast %23 : vector<16xf32> to vector<16x1xf32>
    %25 = arith.subf %18, %24 : vector<16x1xf32>
    %c16_i32 = arith.constant 16 : i32
    %26 = arith.muli %arg0, %c16_i32 : i32
    %27 = tpu.iota {dimensions = array<i32: 0>} : vector<16x1xi32>
    %28 = vector.broadcast %26 : i32 to vector<16x1xi32>
    %29 = arith.addi %28, %27 : vector<16x1xi32>
    %c16_i32_11 = arith.constant 16 : i32
    %30 = vector.broadcast %c16_i32_11 : i32 to vector<16x1xi32>
    %31 = arith.cmpi slt, %29, %30 : vector<16x1xi32>
    %cst_12 = arith.constant 0.000000e+00 : f32
    %32 = vector.broadcast %cst_12 : f32 to vector<16x1xf32>
    %33 = arith.select %31, %25, %32 : vector<16x1xi1>, vector<16x1xf32>
    %34 = vector.shape_cast %33 : vector<16x1xf32> to vector<1x16x1xf32>
    %cst_13 = arith.constant dense<0.000000e+00> : vector<1xf32>
    %35 = vector.multi_reduction <add>, %34, %cst_13 [1, 2] : vector<1x16x1xf32> to vector<1xf32>
    %36 = vector.shape_cast %35 : vector<1xf32> to vector<1x1x1xf32>
    %37 = vector.extract %36[0, 0, 0] : f32 from vector<1x1x1xf32>
    %38 = vector.broadcast %37 : f32 to vector<1x8x128xf32>
    %c0_14 = arith.constant 0 : index
    %c0_15 = arith.constant 0 : index
    %c0_16 = arith.constant 0 : index
    %39 = vector.load %arg5[%c0_14, %c0_15, %c0_16] : memref<1x8x128xf32, #tpu.memory_space<vmem>>, vector<1x8x128xf32>
    tpu.vector_store %arg5[%c0_14, %c0_15, %c0_16], %38 {strides = array<i32>} : memref<1x8x128xf32, #tpu.memory_space<vmem>>, vector<1x8x128xf32>,
    return
  }
  func.func @transform_0(%arg0: i32) -> (i32, i32) {
    %c0_i32 = arith.constant 0 : i32
    %c0_i32_0 = arith.constant 0 : i32
    return %arg0, %c0_i32 : i32, i32
  }
  func.func @transform_1(%arg0: i32) -> (i32, i32) {
    %c0_i32 = arith.constant 0 : i32
    %c0_i32_0 = arith.constant 0 : i32
    return %arg0, %c0_i32 : i32, i32
  }
  func.func @transform_2(%arg0: i32) -> (i32, i32) {
    %c0_i32 = arith.constant 0 : i32
    %c0_i32_0 = arith.constant 0 : i32
    %c0_i32_1 = arith.constant 0 : i32
    return %c0_i32, %c0_i32_0 : i32, i32
  }
  func.func @transform_3(%arg0: i32) -> (i32, i32) {
    %c0_i32 = arith.constant 0 : i32
    %c0_i32_0 = arith.constant 0 : i32
    return %arg0, %c0_i32 : i32, i32
  }
  func.func @transform_4(%arg0: i32) -> (i32, i32, i32) {
    %c0_i32 = arith.constant 0 : i32
    %c0_i32_0 = arith.constant 0 : i32
    %c0_i32_1 = arith.constant 0 : i32
    return %arg0, %c0_i32, %c0_i32_0 : i32, i32, i32
  }
}

</mosaic_0001>

<bundles_post_ra>
// kernel: tpu_custom_call.1
= control target key start
LH: loop header
LB: loop body
LE: loop exit
PB: predicated region body
PF: predicated region fallthrough
CT: control target
= control target key end

     0   :  { %10 = vsyncpa [#allocation3], 0  ;;  %s366_s0 = inlined_call_operand.vmem [shape: s32[16,1], index: 0, kind: input, shape index: {}]   ;;  %s367_s1 = inlined_call_operand.vmem [shape: s32[16,1], index: 1, kind: input, shape index: {}]   ;;  %s368_s2 = inlined_call_operand.hbm [shape: f32[128,128], index: 2, kind: input, shape index: {}]   ;;  %s369_s3 = inlined_call_operand.hbm [shape: f32[16,128], index: 3, kind: output, shape index: {0}]   ;;  %s370_s4 = inlined_call_operand.hbm [shape: f32[1,8,128], index: 4, kind: output, shape index: {1}]  }
   0x1   :  { %11 = vsyncpa [#allocation4], 0 }
   0x2   :  { %12 = vsyncpa [#allocation7], 0  ;;  %s21_s17 = sshll.u32 %s368_s2, 4  ;;  %s307_s18 = smov [#allocation2]   ;;  %s22_s17 = int_to_ptr.hbm [resolvable:$true] %s21_s17 }
   0x3   :  { %s23_s19 = sshll.u32 %s307_s18, 4  ;;  %s308_s20 = smov 128   ;;  %s24_s19 = int_to_ptr.vmem [resolvable:$true] %s23_s19 }
   0x4   :  { %s309_s21 = smov 8  }
   0x5   :  { %29 = dma.hbm_to_vmem [thread:$0]  %s22_s17, 2048, %s24_s19, [#allocation3], %s308_s20, %s308_s20, %s309_s21  }
   0x6   :  { %301 = dma.done.wait [#allocation3], 2048  }
   0x7   :  { %302 = vsyncadd [#allocation3], 4294965248  ;;  %v310_v0 = vmov 0   ;;  %v34_v1 = vld [vmem:[%s366_s0] sm:$0xff]  ;;  %v53_v2 = vld [vmem:[#allocation2 + $0x78] sm:$0xff]  ;;  %v54_v21 = vlaneseq  ;;  %v311_v24 = vmov 1.0  }
   0x8   :  { %219 = vset.pattern.permute.xlu0 %v310_v0  ;;  %220 = vset.pattern.permute.xlu2 %v310_v0  ;;  %v52_v3 = vld [vmem:[#allocation2 + $0x70] sm:$0xff]  ;;  %v51_v4 = vld [vmem:[#allocation2 + $0x68] sm:$0xff]  ;;  %v50_v5 = vld [vmem:[#allocation2 + $0x60] sm:$0xff]  ;;  %vm140_vm4 = vcmask 7168   ;;  %s161_s5 = sshll.u32 %s369_s3, 4  ;;  %s313_s6 = smov [#allocation6]   ;;  %s162_s5 = int_to_ptr.hbm [resolvable:$true] %s161_s5 }
   0x9   :  { %57 = vperm.xlu0 %219, %v34_v1   ;;  %68 = vmatpush.msra.mxu0 %v53_v2  ;;  %v35_v6 = vld [vmem:[%s366_s0 + $0x8] sm:$0xff]  ;;  %v49_v7 = vld [vmem:[#allocation2 + $0x58] sm:$0xff]  ;;  %v48_v8 = vld [vmem:[#allocation2 + $0x50] sm:$0xff]  ;;  %v55_v22 = vand.u32 127, %v54_v21  ;;  %s173_s7 = sshll.u32 %s313_s6, 4  ;;  %s175_s3 = sshll.u32 %s370_s4, 4  ;;  %s174_s7 = int_to_ptr.vmem [resolvable:$true] %s173_s7  ;;  %s176_s3 = int_to_ptr.hbm [resolvable:$true] %s175_s3 }
   0xa   :  { %194 = vmatpush.msra.mxu1 %v53_v2  ;;  %v47_v9 = vld [vmem:[#allocation2 + $0x48] sm:$0xff]  ;;  %v46_v10 = vld [vmem:[#allocation2 + $0x40] sm:$0xff]  ;;  %v45_v11 = vld [vmem:[#allocation2 + $0x38] sm:$0xff] }
   0xb   :  { %69 = vmatpush.msra.mxu0 %v52_v3  ;;  %v44_v12 = vld [vmem:[#allocation2 + $0x30] sm:$0xff]  ;;  %v43_v13 = vld [vmem:[#allocation2 + $0x28] sm:$0xff]  ;;  %v42_v14 = vld [vmem:[#allocation2 + $0x20] sm:$0xff] }
   0xc   :  { %195 = vmatpush.msra.mxu1 %v52_v3  ;;  %v41_v15 = vld [vmem:[#allocation2 + $0x18] sm:$0xff]  ;;  %v40_v16 = vld [vmem:[#allocation2 + $0x10] sm:$0xff]  ;;  %v39_v17 = vld [vmem:[#allocation2 + $0x8] sm:$0xff] }
   0xd   :  { %70 = vmatpush.msra.mxu0 %v51_v4  ;;  %v38_v18 = vld [vmem:[#allocation2] sm:$0xff]  ;;  %v37_v20 = vld [vmem:[%s367_s1 + $0x8] sm:$0xff] }
   0xe   :  { %196 = vmatpush.msra.mxu1 %v51_v4  ;;  %v36_v19 = vld [vmem:[%s367_s1] sm:$0xff]  ;;  %s312_s1 = smov [#allocation5]  }
   0xf   :  { %71 = vmatpush.msra.mxu0 %v50_v5  ;;  %114 = vperm.xlu2 %220, %v36_v19   ;;  %s159_s28 = sshll.u32 %s312_s1, 4  ;;  %s160_s28 = int_to_ptr.vmem [resolvable:$true] %s159_s28 }
  0x10   :  { %197 = vmatpush.msra.mxu1 %v50_v5 }
  0x11   :  { %60 = vperm.xlu0 %219, %v35_v6   ;;  %72 = vmatpush.msra.mxu0 %v49_v7 }
  0x12   :  { %198 = vmatpush.msra.mxu1 %v49_v7 }
  0x13   :  { %73 = vmatpush.msra.mxu0 %v48_v8 }
  0x14   :  { %199 = vmatpush.msra.mxu1 %v48_v8 }
  0x15   :  { %74 = vmatpush.msra.mxu0 %v47_v9 }
  0x16   :  { %200 = vmatpush.msra.mxu1 %v47_v9 }
  0x17   :  { %75 = vmatpush.msra.mxu0 %v46_v10  ;;  %117 = vperm.xlu2 %220, %v37_v20  }
  0x18   :  { %201 = vmatpush.msra.mxu1 %v46_v10 }
  0x19   :  { %76 = vmatpush.msra.mxu0 %v45_v11 }
  0x1a   :  { %202 = vmatpush.msra.mxu1 %v45_v11 }
  0x1b   :  { %77 = vmatpush.msra.mxu0 %v44_v12 }
  0x1c   :  { %203 = vmatpush.msra.mxu1 %v44_v12 }
  0x1d   :  { %78 = vmatpush.msra.mxu0 %v43_v13 }
  0x1e   :  { %204 = vmatpush.msra.mxu1 %v43_v13 }
  0x1f   :  { %79 = vmatpush.msra.mxu0 %v42_v14 }
  0x20   :  { %205 = vmatpush.msra.mxu1 %v42_v14 }
  0x21   :  { %80 = vmatpush.msra.mxu0 %v41_v15 }
  0x22   :  { %206 = vmatpush.msra.mxu1 %v41_v15 }
  0x23   :  { %81 = vmatpush.msra.mxu0 %v40_v16 }
  0x24   :  { %207 = vmatpush.msra.mxu1 %v40_v16 }
  0x25   :  { %82 = vmatpush.msra.mxu0 %v39_v17 }
  0x26   :  { %208 = vmatpush.msra.mxu1 %v39_v17 }
  0x27   :  { %83 = vmatpush.msra.mxu0 %v38_v18 }
  0x28   :  { %209 = vmatpush.msra.mxu1 %v38_v18 }
  0x69   :  { %v115_v26 = vpop.permute.xlu2 %114 }
  0x6a   :  { %vm119_vm2 = vcmp.eq.s32.totalorder %v55_v22, %v115_v26 }
  0x71   :  { %v118_v38 = vpop.permute.xlu2 %117 }
  0x72   :  { %vm120_vm3 = vcmp.eq.s32.totalorder %v55_v22, %v118_v38 }
  0x7b   :  { %v58_v23 = vpop.permute.xlu0 %57 }
  0x7c   :  { %vm62_vm0 = vcmp.eq.s32.totalorder %v55_v22, %v58_v23 }
  0x7d   :  { %192 = vmatmul.msk.f32.vlgmr.msra.gmra.mxu0 %vm62_vm0, %v311_v24 }
  0x83   :  { %v61_v25 = vpop.permute.xlu0 %60 }
  0x84   :  { %vm63_vm1 = vcmp.eq.s32.totalorder %v55_v22, %v61_v25 }
  0x85   :  { %193 = vmatmul.msk.f32.vlgmr.msra.gmra.mxu1 %vm63_vm1, %v311_v24 }
  0xfa   :  { %v85_v27 = vpop.f32.mrf.mxu0 }
  0xfb   :  { %91 = vst [vmem:[#allocation5] sm:$0xff] %v85_v27  ;;  %93 = vmax.xlane.f32.xlu1 %v85_v27  ;;  %v121_v28 = vsel %vm119_vm2, %v85_v27, 0.0 }
  0xfc   :  { %123 = vadd.xlane.f32.xlu2 %v121_v28 }
 0x102   :  { %v88_v29 = vpop.f32.mrf.mxu1 }
 0x103   :  { %92 = vst [vmem:[#allocation5 + $0x8] sm:$0xff] %v88_v29  ;;  %95 = vmax.xlane.f32.xlu1 %v88_v29  ;;  %v122_v39 = vsel %vm120_vm3, %v88_v29, 0.0 }
 0x104   :  { %167 = dma.vmem_to_hbm [thread:$0]  %s160_s28, 256, %s162_s5, [#allocation4], %s308_s20, %s308_s20, %s309_s21  }
 0x16e   :  { %v94_v30 = vpop.xlane.xlu1 %93 }
 0x16f   :  { %v97_v31 = vsub.f32 %v85_v27, %v94_v30  ;;  %v124_v47 = vpop.xlane.xlu2 %123 }
 0x171   :  { %v99_v32 = vmul.f32 1.442695, %v97_v31 }
 0x173   :  { %221 = vpow2.f32 %v99_v32 }
 0x176   :  { %v96_v33 = vpop.xlane.xlu1 %95 }
 0x177   :  { %v98_v34 = vsub.f32 %v88_v29, %v96_v33 }
 0x179   :  { %v222_v35 = vpop.eup %221  ;;  %v101_v36 = vmul.f32 1.442695, %v98_v34 }
 0x17a   :  { %103 = vadd.xlane.f32.xlu0 %v222_v35 }
 0x17b   :  { %223 = vpow2.f32 %v101_v36 }
 0x181   :  { %v224_v37 = vpop.eup %223 }
 0x182   :  { %105 = vadd.xlane.f32.xlu1 %v224_v37 }
 0x18a   :  { %125 = vadd.xlane.f32.xlu1 %v122_v39 }
 0x1ed   :  { %v104_v40 = vpop.xlane.xlu0 %103 }
 0x1ee   :  { %225 = vlog2.f32 %v104_v40 }
 0x1f4   :  { %v226_v41 = vpop.eup %225 }
 0x1f5   :  { %v106_v42 = vpop.xlane.xlu1 %105  ;;  %v108_v43 = vmul.f32 0.6931472, %v226_v41 }
 0x1f6   :  { %227 = vlog2.f32 %v106_v42 }
 0x1f7   :  { %v111_v44 = vadd.f32 %v108_v43, %v94_v30 }
 0x1f9   :  { %v127_v49 = vsub.f32 %v111_v44, %v124_v47 }
 0x1fb   :  { %v141_v52 = vsel %vm140_vm4, %v127_v49, 0.0 }
 0x1fc   :  { %v228_v45 = vpop.eup %227 }
 0x1fd   :  { %v110_v46 = vmul.f32 0.6931472, %v228_v45  ;;  %v126_v50 = vpop.xlane.xlu1 %125 }
 0x1ff   :  { %v112_v48 = vadd.f32 %v110_v46, %v96_v33 }
 0x201   :  { %v128_v51 = vsub.f32 %v112_v48, %v126_v50 }
 0x203   :  { %v142_v53 = vsel %vm140_vm4, %v128_v51, 0.0 }
 0x204   :  { %v143_v54 = vadd.f32 %v142_v53, %v141_v52 }
 0x206   :  { %144 = vadd.xlane.f32.xlu1 %v143_v54 }
 0x279   :  { %v145_v55 = vpop.xlane.xlu1 %144 }
 0x27a   :  { %v146_v56 = vrot.slane %v145_v55, 4 }
 0x27c   :  { %v147_v57 = vadd.f32 %v146_v56, %v145_v55 }
 0x27e   :  { %v148_v58 = vrot.slane %v147_v57, 2 }
 0x280   :  { %v149_v59 = vadd.f32 %v148_v58, %v147_v57 }
 0x282   :  { %v150_v60 = vrot.slane %v149_v59, 1 }
 0x284   :  { %v151_v61 = vadd.f32 %v150_v60, %v149_v59 }
 0x286   :  { %210 = vpush %v151_v61 }
 0x2b7   :  { %s211_s10 = spop %210 }
 0x2b8   :  { %v153_v62 = vstv %s211_s10 }
 0x2b9   :  { %154 = vst [vmem:[#allocation6] sm:$0xff] %v153_v62 }
 0x2ba   :  { %178 = dma.vmem_to_hbm [thread:$0]  %s174_s7, 128, %s176_s3, [#allocation7]  }
 0x2bb   :  { %303 = dma.done.wait [#allocation4], 256  }
 0x2bc   :  { %304 = vsyncadd [#allocation4], 4294967040 }
 0x2bd   :  { %305 = dma.done.wait [#allocation7], 128  }
 0x2be   :  { %306 = vsyncadd [#allocation7], 4294967168 }
 0x2bf   :  { %187 = vsyncpa [#allocation3], 1 }
 0x2c0   :  { %188 = vsyncpa [#allocation4], 1 }
 0x2c1   :  { %189 = vsyncpa [#allocation7], 1 }

</bundles_post_ra>
